<compile_context>
chip_gen: v6e
topology: v6e:2x2x1
jax: 0.10.0
libtpu: 0.0.40
codegen_flags: <defaults>
</compile_context>

<pallas_src>
import functools

import numpy as np
import jax
import jax.numpy as jnp
from jax.experimental import pallas as pl
from jax.experimental.pallas import tpu as pltpu


def _round_up(x, m):
    return ((x + m - 1) // m) * m


# ----------------------------------------------------------------------------
# Fused forward kernel (grid=(1,), all operands are full-extent VMEM blocks)
# ----------------------------------------------------------------------------
def _wsdnn_fused_kernel(patches_ref, w_enc_ref, b_enc_ref,
                        m3_ref, w1p_ref, b1_ref,
                        w2_ref, b2_ref,
                        wh_ref, bh_ref,
                        o_ref, *, nc_pad, n_rois):
    f32 = jnp.float32
    bf16 = jnp.bfloat16

    # --- encoder stand-in: stride-P patchify conv as one MXU matmul + ReLU ---
    feat = jnp.dot(patches_ref[...], w_enc_ref[...], preferred_element_type=f32)
    feat = jnp.maximum(feat + b_enc_ref[...], 0.0)                    # (HW, Cf) f32

    # --- ROI-align as a precomputed linear operator, batched over bins p -----
    P, Rp, HW = m3_ref.shape
    Cf = feat.shape[1]
    featb = jnp.broadcast_to(feat.astype(bf16), (P, HW, Cf))          # hoisted once
    pooled = jnp.einsum('prw,pwc->prc', m3_ref[...], featb,
                        preferred_element_type=f32)                   # (P, Rp, Cf)

    # --- classifier fc1 as a blocked contraction over (p, c), then ReLU ------
    # PyTorch flatten order of roi_align output is (c, ph, pw); w1p was
    # pre-permuted on the host so this contraction matches Linear(flat, H).
    h1c = jnp.einsum('prc,pch->prh', pooled.astype(bf16), w1p_ref[...],
                     preferred_element_type=f32)                      # (P, Rp, H)
    h1 = jnp.maximum(jnp.sum(h1c, axis=0) + b1_ref[...], 0.0)          # (Rp, H)

    # --- classifier fc2 + ReLU (Dropout layers are identity at inference) ----
    h2 = jnp.dot(h1.astype(bf16), w2_ref[...], preferred_element_type=f32)
    h2 = jnp.maximum(h2 + b2_ref[...], 0.0)                            # (Rp, H)

    # --- heads: one fused matmul for [score | bbox] ---------------------------
    sb = jnp.dot(h2.astype(bf16), wh_ref[...], preferred_element_type=f32)
    sb = sb + bh_ref[...]                                              # (Rp, 2*nc_pad)
    s = sb[:, :nc_pad]
    b = sb[:, nc_pad:]

    # softmax over axis 0 (over ROIs). Valid because ALL ROIs live in this
    # single block; padded ROI rows are masked out of the normalization.
    row = jax.lax.broadcasted_iota(jnp.int32, s.shape, 0)
    s = jnp.where(row < n_rois, s, -1e30)
    m = jnp.max(s, axis=0, keepdims=True)
    e = jnp.exp(s - m)
    sm = e * pl.reciprocal(jnp.sum(e, axis=0, keepdims=True), approx=True)
    sig = pl.reciprocal(1.0 + jnp.exp(-b), approx=True)
    o_ref[...] = (sm * sig).astype(o_ref.dtype)


def _zero2(i):
    return (0, 0)


def _zero3(i):
    return (0, 0, 0)


def _full_block(a):
    return pl.BlockSpec(a.shape, _zero3 if a.ndim == 3 else _zero2)


def _wsdnn_fused_call(patches, w_enc, b_enc, m3, w1p, b1, w2, b2, wh, bh,
                      *, nc_pad, n_rois):
    rp = m3.shape[1]
    args = (patches, w_enc, b_enc, m3, w1p, b1, w2, b2, wh, bh)
    return pl.pallas_call(
        functools.partial(_wsdnn_fused_kernel, nc_pad=nc_pad, n_rois=n_rois),
        out_shape=jax.ShapeDtypeStruct((rp, nc_pad), jnp.float32),
        grid=(1,),
        in_specs=[_full_block(a) for a in args],
        out_specs=pl.BlockSpec((rp, nc_pad), _zero2),
        compiler_params=pltpu.CompilerParams(
            dimension_semantics=("arbitrary",)),
    )(*args)


# ----------------------------------------------------------------------------
# ROI-align as a linear operator (host-side numpy, fully vectorized per ROI;
# torchvision semantics: aligned=False, sampling_ratio=-1). Hoisted out of the
# jitted TPU path.
# ----------------------------------------------------------------------------
def roi_align_matrix(rois_np, H, W, pooled_h, pooled_w, spatial_scale):
    R = rois_np.shape[0]
    P = pooled_h * pooled_w
    M = np.zeros((R * P, H * W), dtype=np.float32)
    for r in range(R):
        x1, y1, x2, y2 = [float(v) for v in rois_np[r]]
        rsw, rsh = x1 * spatial_scale, y1 * spatial_scale
        rew, reh = x2 * spatial_scale, y2 * spatial_scale
        roi_w = max(rew - rsw, 1.0)
        roi_h = max(reh - rsh, 1.0)
        bin_h = roi_h / pooled_h
        bin_w = roi_w / pooled_w
        sr_h = int(np.ceil(roi_h / pooled_h))
        sr_w = int(np.ceil(roi_w / pooled_w))
        count = max(sr_h * sr_w, 1)

        # sample coordinates, vectorized over (ph, iy) and (pw, ix)
        ys = rsh + (np.arange(pooled_h)[:, None]
                    + (np.arange(sr_h)[None, :] + 0.5) / sr_h) * bin_h
        xs = rsw + (np.arange(pooled_w)[:, None]
                    + (np.arange(sr_w)[None, :] + 0.5) / sr_w) * bin_w
        y = np.broadcast_to(ys[:, None, :, None],
                            (pooled_h, pooled_w, sr_h, sr_w)).reshape(-1)
        x = np.broadcast_to(xs[None, :, None, :],
                            (pooled_h, pooled_w, sr_h, sr_w)).reshape(-1)

        valid = ~((y < -1.0) | (y > H) | (x < -1.0) | (x > W))
        yy = np.clip(y, 0.0, H - 1.0)
        xx = np.clip(x, 0.0, W - 1.0)
        y_lo = np.floor(yy).astype(np.int64)
        x_lo = np.floor(xx).astype(np.int64)
        y_hi = np.minimum(y_lo + 1, H - 1)
        x_hi = np.minimum(x_lo + 1, W - 1)
        ly = (yy - y_lo).astype(np.float32)
        lx = (xx - x_lo).astype(np.float32)
        hy = 1.0 - ly
        hx = 1.0 - lx

        rows = r * P + np.repeat(np.arange(P), sr_h * sr_w)
        w_v = valid.astype(np.float32) / count
        for cols, wts in ((y_lo * W + x_lo, hy * hx),
                          (y_lo * W + x_hi, hy * lx),
                          (y_hi * W + x_lo, ly * hx),
                          (y_hi * W + x_hi, ly * lx)):
            np.add.at(M, (rows, cols), wts * w_v)
    return M


def _roi_align_operator(rois_np, H, W, pooled_h, pooled_w, spatial_scale, r_pad):
    """(P, Rp, H*W) pooling operator; slice [p, r, :] pools ROI r, bin p."""
    R = rois_np.shape[0]
    P = pooled_h * pooled_w
    M = roi_align_matrix(rois_np, H, W, pooled_h, pooled_w, spatial_scale)
    M3 = M.reshape(R, P, H * W).transpose(1, 0, 2)
    if r_pad > R:
        M3 = np.concatenate([M3, np.zeros((P, r_pad - R, H * W), np.float32)],
                            axis=1)
    return np.ascontiguousarray(M3)


# ----------------------------------------------------------------------------
# Model (small synthetic configuration of WSDNN_Resnet)
# ----------------------------------------------------------------------------
class WSDNNResnetPallas:
    def __init__(self, key, roi_size=(4, 4), num_class=1,
                 feat_channels=32, hidden=128, patch=16):
        self.roi_size = roi_size
        self.num_class = num_class
        self.feat_channels = feat_channels
        self.hidden = hidden
        self.patch = patch
        self.nc_pad = _round_up(num_class, 128)

        Ph, Pw = roi_size
        P = Ph * Pw
        flat = feat_channels * P

        ks = jax.random.split(key, 10)
        n = jax.random.normal
        # logical parameters (PyTorch layouts) --------------------------------
        w_enc = n(ks[0], (3 * patch * patch, feat_channels), jnp.float32) / np.sqrt(3 * patch * patch)
        b_enc = n(ks[1], (feat_channels,), jnp.float32) * 0.01
        # classifier: Linear(flat,H) -> ReLU -> Linear(H,H) -> Dropout -> ReLU
        # w1 rows follow the PyTorch flatten order (c, ph, pw).
        w1 = n(ks[2], (flat, hidden), jnp.float32) / np.sqrt(flat)
        b1 = n(ks[3], (hidden,), jnp.float32) * 0.01
        w2 = n(ks[4], (hidden, hidden), jnp.float32) / np.sqrt(hidden)
        b2 = n(ks[5], (hidden,), jnp.float32) * 0.01
        w_score = n(ks[6], (hidden, num_class), jnp.float32) / np.sqrt(hidden)
        b_score = n(ks[7], (num_class,), jnp.float32) * 0.01
        w_bbox = n(ks[8], (hidden, num_class), jnp.float32) / np.sqrt(hidden)
        b_bbox = n(ks[9], (num_class,), jnp.float32) * 0.01

        # pre-pad / pre-permute / pre-cast ONCE (no per-forward pad ops) ------
        bf16 = jnp.bfloat16
        self.w_enc_b = w_enc.astype(bf16)                               # (3*p*p, Cf)
        self.b_enc_r = b_enc.reshape(1, feat_channels)                  # (1, Cf)
        # W1p[p, c, h] = w1[c*P + p, h]  (accounts for the (c, ph, pw) flatten)
        self.w1p_b = jnp.transpose(
            w1.reshape(feat_channels, P, hidden), (1, 0, 2)).astype(bf16)  # (P, Cf, H)
        self.b1_r = b1.reshape(1, hidden)
        self.w2_b = w2.astype(bf16)
        self.b2_r = b2.reshape(1, hidden)
        ncp = self.nc_pad
        wh = jnp.zeros((hidden, 2 * ncp), jnp.float32)
        wh = wh.at[:, :num_class].set(w_score).at[:, ncp:ncp + num_class].set(w_bbox)
        self.wh_b = wh.astype(bf16)                                     # (H, 2*ncp)
        bh = jnp.zeros((1, 2 * ncp), jnp.float32)
        bh = bh.at[0, :num_class].set(b_score).at[0, ncp:ncp + num_class].set(b_bbox)
        self.bh_r = bh                                                  # (1, 2*ncp)

        self._jit_forward = jax.jit(self._forward_impl, static_argnames=("n_rois",))

    def _forward_impl(self, x, m3, *, n_rois):
        N, C, Himg, Wimg = x.shape
        p = self.patch
        Hf, Wf = Himg // p, Wimg // p
        # im2col for the stride-p patchify encoder stand-in (cheap XLA glue)
        patches = jnp.transpose(
            x.reshape(N, C, Hf, p, Wf, p), (0, 2, 4, 1, 3, 5)
        ).reshape(N * Hf * Wf, C * p * p).astype(jnp.bfloat16)

        out = _wsdnn_fused_call(
            patches, self.w_enc_b, self.b_enc_r, m3,
            self.w1p_b, self.b1_r, self.w2_b, self.b2_r,
            self.wh_b, self.bh_r,
            nc_pad=self.nc_pad, n_rois=n_rois)
        # (Rp, nc_pad) -> (R, 1, num_class), matching cls_prob.unsqueeze(1)
        return out[:n_rois, :self.num_class][:, None, :]

    def forward(self, x, rois):
        """x: (1, 3, Himg, Wimg) NCHW; rois: (R, 4) = (x1, y1, x2, y2) image coords."""
        assert x.shape[0] == 1, "single-image forward (matches the PyTorch usage)"
        _, _, Himg, Wimg = x.shape
        p = self.patch
        Hf, Wf = Himg // p, Wimg // p
        Ph, Pw = self.roi_size
        R = int(rois.shape[0])
        Rp = _round_up(max(R, 1), 8)
        # Host-side bilinear sampling operator (hoisted out of the jitted path).
        m3_np = _roi_align_operator(np.asarray(rois, np.float32), Hf, Wf,
                                    Ph, Pw, Hf / Himg, Rp)
        m3 = jnp.asarray(m3_np, dtype=jnp.bfloat16)        # (P, Rp, Hf*Wf)
        return self._jit_forward(x, m3, n_rois=R)


# ----------------------------------------------------------------------------
# Main
# ----------------------------------------------------------------------------
if __name__ == "__main__":
    key = jax.random.PRNGKey(0)
    k_param, k_img, k_xy, k_wh = jax.random.split(key, 4)

    model = WSDNNResnetPallas(k_param, roi_size=(4, 4), num_class=1,
                              feat_channels=32, hidden=128, patch=16)

    # small deterministic inputs
    x = jax.random.normal(k_img, (1, 3, 64, 64), jnp.float32)
    xy1 = jax.random.uniform(k_xy, (8, 2), minval=0.0, maxval=40.0)
    wh = jax.random.uniform(k_wh, (8, 2), minval=8.0, maxval=24.0)
    rois = jnp.concatenate([xy1, jnp.minimum(xy1 + wh, 64.0)], axis=1)  # (R, 4)

    out = model.forward(x, rois)
    out = jax.block_until_ready(out)
    assert out.shape == (8, 1, 1), out.shape
    assert bool(jnp.all(jnp.isfinite(out)))
    print("KERNEL_OK")
</pallas_src>

<mosaic_0001>
module attributes {stable_mosaic.version = 11 : i64} {
  func.func @_wsdnn_fused_kernel(%arg0: i32, %arg1: memref<16x768xbf16, #tpu.memory_space<vmem>>, %arg2: memref<768x32xbf16, #tpu.memory_space<vmem>>, %arg3: memref<1x32xf32, #tpu.memory_space<vmem>>, %arg4: memref<16x8x16xbf16, #tpu.memory_space<vmem>>, %arg5: memref<16x32x128xbf16, #tpu.memory_space<vmem>>, %arg6: memref<1x128xf32, #tpu.memory_space<vmem>>, %arg7: memref<128x128xbf16, #tpu.memory_space<vmem>>, %arg8: memref<1x128xf32, #tpu.memory_space<vmem>>, %arg9: memref<128x256xbf16, #tpu.memory_space<vmem>>, %arg10: memref<1x256xf32, #tpu.memory_space<vmem>>, %arg11: memref<8x128xf32, #tpu.memory_space<vmem>>) attributes {dimension_semantics = [#tpu.dimension_semantics<arbitrary>], iteration_bounds = array<i64: 1>, scalar_prefetch = 0 : i64, scratch_operands = 0 : i64, tpu.core_type = #tpu.core_type<tc>, window_params = [{pipeline_mode = #tpu.pipeline_mode<synchronous>, transform_indices = @transform_0, window_bounds = array<i64: 16, 768>}, {pipeline_mode = #tpu.pipeline_mode<synchronous>, transform_indices = @transform_1, window_bounds = array<i64: 768, 32>}, {pipeline_mode = #tpu.pipeline_mode<synchronous>, transform_indices = @transform_2, window_bounds = array<i64: 1, 32>}, {pipeline_mode = #tpu.pipeline_mode<synchronous>, transform_indices = @transform_3, window_bounds = array<i64: 16, 8, 16>}, {pipeline_mode = #tpu.pipeline_mode<synchronous>, transform_indices = @transform_4, window_bounds = array<i64: 16, 32, 128>}, {pipeline_mode = #tpu.pipeline_mode<synchronous>, transform_indices = @transform_5, window_bounds = array<i64: 1, 128>}, {pipeline_mode = #tpu.pipeline_mode<synchronous>, transform_indices = @transform_6, window_bounds = array<i64: 128, 128>}, {pipeline_mode = #tpu.pipeline_mode<synchronous>, transform_indices = @transform_7, window_bounds = array<i64: 1, 128>}, {pipeline_mode = #tpu.pipeline_mode<synchronous>, transform_indices = @transform_8, window_bounds = array<i64: 128, 256>}, {pipeline_mode = #tpu.pipeline_mode<synchronous>, transform_indices = @transform_9, window_bounds = array<i64: 1, 256>}, {pipeline_mode = #tpu.pipeline_mode<synchronous>, transform_indices = @transform_10, window_bounds = array<i64: 8, 128>}]} {
    %c0 = arith.constant 0 : index
    %c0_0 = arith.constant 0 : index
    %0 = vector.load %arg1[%c0, %c0_0] : memref<16x768xbf16, #tpu.memory_space<vmem>>, vector<16x768xbf16>
    %c0_1 = arith.constant 0 : index
    %c0_2 = arith.constant 0 : index
    %1 = vector.load %arg2[%c0_1, %c0_2] : memref<768x32xbf16, #tpu.memory_space<vmem>>, vector<768x32xbf16>
    %cst = arith.constant dense<0.000000e+00> : vector<16x32xf32>
    %2 = tpu.matmul %0, %1, %cst {dimension_numbers = #tpu.dot_dimension_numbers<[1], [0], [0], [1], [0, 0, 1, 1], [], []>} : vector<16x768xbf16>, vector<768x32xbf16>, vector<16x32xf32> -> vector<16x32xf32>
    %c0_3 = arith.constant 0 : index
    %c0_4 = arith.constant 0 : index
    %3 = vector.load %arg3[%c0_3, %c0_4] : memref<1x32xf32, #tpu.memory_space<vmem>>, vector<1x32xf32>
    %4 = vector.broadcast %3 : vector<1x32xf32> to vector<16x32xf32>
    %5 = arith.addf %2, %4 : vector<16x32xf32>
    %cst_5 = arith.constant 0.000000e+00 : f32
    %6 = vector.broadcast %cst_5 : f32 to vector<16x32xf32>
    %7 = arith.maximumf %5, %6 : vector<16x32xf32>
    %8 = arith.truncf %7 : vector<16x32xf32> to vector<16x32xbf16>
    %9 = vector.shape_cast %8 : vector<16x32xbf16> to vector<1x16x32xbf16>
    %10 = vector.broadcast %9 : vector<1x16x32xbf16> to vector<16x16x32xbf16>
    %c0_6 = arith.constant 0 : index
    %c0_7 = arith.constant 0 : index
    %c0_8 = arith.constant 0 : index
    %11 = vector.load %arg4[%c0_6, %c0_7, %c0_8] : memref<16x8x16xbf16, #tpu.memory_space<vmem>>, vector<16x8x16xbf16>
    "tpu.trace_start"() <{level = 10 : i32, message = "prw,pwc->prc"}> : () -> ()
    %cst_9 = arith.constant dense<0.000000e+00> : vector<16x8x32xf32>
    %12 = tpu.matmul %11, %10, %cst_9 {dimension_numbers = #tpu.dot_dimension_numbers<[2], [1], [1], [2], [0, 0, 0, 1, 1, 2], [0], [0]>} : vector<16x8x16xbf16>, vector<16x16x32xbf16>, vector<16x8x32xf32> -> vector<16x8x32xf32>
    "tpu.trace_stop"() : () -> ()
    %13 = arith.truncf %12 : vector<16x8x32xf32> to vector<16x8x32xbf16>
    %c0_10 = arith.constant 0 : index
    %c0_11 = arith.constant 0 : index
    %c0_12 = arith.constant 0 : index
    %14 = vector.load %arg5[%c0_10, %c0_11, %c0_12] : memref<16x32x128xbf16, #tpu.memory_space<vmem>>, vector<16x32x128xbf16>
    "tpu.trace_start"() <{level = 10 : i32, message = "prc,pch->prh"}> : () -> ()
    %cst_13 = arith.constant dense<0.000000e+00> : vector<16x8x128xf32>
    %15 = tpu.matmul %13, %14, %cst_13 {dimension_numbers = #tpu.dot_dimension_numbers<[2], [1], [1], [2], [0, 0, 0, 1, 1, 2], [0], [0]>} : vector<16x8x32xbf16>, vector<16x32x128xbf16>, vector<16x8x128xf32> -> vector<16x8x128xf32>
    "tpu.trace_stop"() : () -> ()
    %cst_14 = arith.constant dense<0.000000e+00> : vector<8x128xf32>
    %16 = vector.multi_reduction <add>, %15, %cst_14 [0] : vector<16x8x128xf32> to vector<8x128xf32>
    %c0_15 = arith.constant 0 : index
    %c0_16 = arith.constant 0 : index
    %17 = vector.load %arg6[%c0_15, %c0_16] : memref<1x128xf32, #tpu.memory_space<vmem>>, vector<1x128xf32>
    %18 = vector.broadcast %17 : vector<1x128xf32> to vector<8x128xf32>
    %19 = arith.addf %16, %18 : vector<8x128xf32>
    %cst_17 = arith.constant 0.000000e+00 : f32
    %20 = vector.broadcast %cst_17 : f32 to vector<8x128xf32>
    %21 = arith.maximumf %19, %20 : vector<8x128xf32>
    %22 = arith.truncf %21 : vector<8x128xf32> to vector<8x128xbf16>
    %c0_18 = arith.constant 0 : index
    %c0_19 = arith.constant 0 : index
    %23 = vector.load %arg7[%c0_18, %c0_19] : memref<128x128xbf16, #tpu.memory_space<vmem>>, vector<128x128xbf16>
    %cst_20 = arith.constant dense<0.000000e+00> : vector<8x128xf32>
    %24 = tpu.matmul %22, %23, %cst_20 {dimension_numbers = #tpu.dot_dimension_numbers<[1], [0], [0], [1], [0, 0, 1, 1], [], []>} : vector<8x128xbf16>, vector<128x128xbf16>, vector<8x128xf32> -> vector<8x128xf32>
    %c0_21 = arith.constant 0 : index
    %c0_22 = arith.constant 0 : index
    %25 = vector.load %arg8[%c0_21, %c0_22] : memref<1x128xf32, #tpu.memory_space<vmem>>, vector<1x128xf32>
    %26 = vector.broadcast %25 : vector<1x128xf32> to vector<8x128xf32>
    %27 = arith.addf %24, %26 : vector<8x128xf32>
    %cst_23 = arith.constant 0.000000e+00 : f32
    %28 = vector.broadcast %cst_23 : f32 to vector<8x128xf32>
    %29 = arith.maximumf %27, %28 : vector<8x128xf32>
    %30 = arith.truncf %29 : vector<8x128xf32> to vector<8x128xbf16>
    %c0_24 = arith.constant 0 : index
    %c0_25 = arith.constant 0 : index
    %31 = vector.load %arg9[%c0_24, %c0_25] : memref<128x256xbf16, #tpu.memory_space<vmem>>, vector<128x256xbf16>
    %cst_26 = arith.constant dense<0.000000e+00> : vector<8x256xf32>
    %32 = tpu.matmul %30, %31, %cst_26 {dimension_numbers = #tpu.dot_dimension_numbers<[1], [0], [0], [1], [0, 0, 1, 1], [], []>} : vector<8x128xbf16>, vector<128x256xbf16>, vector<8x256xf32> -> vector<8x256xf32>
    %c0_27 = arith.constant 0 : index
    %c0_28 = arith.constant 0 : index
    %33 = vector.load %arg10[%c0_27, %c0_28] : memref<1x256xf32, #tpu.memory_space<vmem>>, vector<1x256xf32>
    %34 = vector.broadcast %33 : vector<1x256xf32> to vector<8x256xf32>
    %35 = arith.addf %32, %34 : vector<8x256xf32>
    %36 = vector.extract_strided_slice %35 {offsets = [0, 0], sizes = [8, 128], strides = [1, 1]} : vector<8x256xf32> to vector<8x128xf32>
    %37 = vector.extract_strided_slice %35 {offsets = [0, 128], sizes = [8, 128], strides = [1, 1]} : vector<8x256xf32> to vector<8x128xf32>
    %38 = tpu.iota {dimensions = array<i32: 0>} : vector<8x128xi32>
    %c8_i32 = arith.constant 8 : i32
    %39 = vector.broadcast %c8_i32 : i32 to vector<8x128xi32>
    %40 = arith.cmpi slt, %38, %39 : vector<8x128xi32>
    %cst_29 = arith.constant -1.000000e+30 : f32
    %41 = vector.broadcast %cst_29 : f32 to vector<8x128xf32>
    %42 = arith.select %40, %36, %41 : vector<8x128xi1>, vector<8x128xf32>
    %cst_30 = arith.constant dense<0xFF800000> : vector<128xf32>
    %43 = vector.multi_reduction <maximumf>, %42, %cst_30 [0] : vector<8x128xf32> to vector<128xf32>
    %44 = vector.shape_cast %43 : vector<128xf32> to vector<1x128xf32>
    %45 = vector.broadcast %44 : vector<1x128xf32> to vector<8x128xf32>
    %46 = arith.subf %42, %45 : vector<8x128xf32>
    %47 = math.exp %46 : vector<8x128xf32>
    %cst_31 = arith.constant dense<0.000000e+00> : vector<128xf32>
    %48 = vector.multi_reduction <add>, %47, %cst_31 [0] : vector<8x128xf32> to vector<128xf32>
    %49 = vector.shape_cast %48 : vector<128xf32> to vector<1x128xf32>
    %50 = tpu.reciprocal %49 {approx = true} : vector<1x128xf32> -> vector<1x128xf32>
    %51 = vector.broadcast %50 : vector<1x128xf32> to vector<8x128xf32>
    %52 = arith.mulf %47, %51 : vector<8x128xf32>
    %cst_32 = arith.constant 0.000000e+00 : f32
    %53 = vector.broadcast %cst_32 : f32 to vector<8x128xf32>
    %54 = arith.subf %53, %37 : vector<8x128xf32>
    %55 = math.exp %54 : vector<8x128xf32>
    %cst_33 = arith.constant 1.000000e+00 : f32
    %56 = vector.broadcast %cst_33 : f32 to vector<8x128xf32>
    %57 = arith.addf %56, %55 : vector<8x128xf32>
    %58 = tpu.reciprocal %57 {approx = true} : vector<8x128xf32> -> vector<8x128xf32>
    %59 = arith.mulf %52, %58 : vector<8x128xf32>
    %c0_34 = arith.constant 0 : index
    %c0_35 = arith.constant 0 : index
    %60 = vector.load %arg11[%c0_34, %c0_35] : memref<8x128xf32, #tpu.memory_space<vmem>>, vector<8x128xf32>
    tpu.vector_store %arg11[%c0_34, %c0_35], %59 {strides = array<i32>} : memref<8x128xf32, #tpu.memory_space<vmem>>, vector<8x128xf32>,
    return
  }
  func.func @transform_0(%arg0: i32) -> (i32, i32) {
    %c0_i32 = arith.constant 0 : i32
    %c0_i32_0 = arith.constant 0 : i32
    %c0_i32_1 = arith.constant 0 : i32
    return %c0_i32, %c0_i32_0 : i32, i32
  }
  func.func @transform_1(%arg0: i32) -> (i32, i32) {
    %c0_i32 = arith.constant 0 : i32
    %c0_i32_0 = arith.constant 0 : i32
    %c0_i32_1 = arith.constant 0 : i32
    return %c0_i32, %c0_i32_0 : i32, i32
  }
  func.func @transform_2(%arg0: i32) -> (i32, i32) {
    %c0_i32 = arith.constant 0 : i32
    %c0_i32_0 = arith.constant 0 : i32
    %c0_i32_1 = arith.constant 0 : i32
    return %c0_i32, %c0_i32_0 : i32, i32
  }
  func.func @transform_3(%arg0: i32) -> (i32, i32, i32) {
    %c0_i32 = arith.constant 0 : i32
    %c0_i32_0 = arith.constant 0 : i32
    %c0_i32_1 = arith.constant 0 : i32
    %c0_i32_2 = arith.constant 0 : i32
    return %c0_i32, %c0_i32_0, %c0_i32_1 : i32, i32, i32
  }
  func.func @transform_4(%arg0: i32) -> (i32, i32, i32) {
    %c0_i32 = arith.constant 0 : i32
    %c0_i32_0 = arith.constant 0 : i32
    %c0_i32_1 = arith.constant 0 : i32
    %c0_i32_2 = arith.constant 0 : i32
    return %c0_i32, %c0_i32_0, %c0_i32_1 : i32, i32, i32
  }
  func.func @transform_5(%arg0: i32) -> (i32, i32) {
    %c0_i32 = arith.constant 0 : i32
    %c0_i32_0 = arith.constant 0 : i32
    %c0_i32_1 = arith.constant 0 : i32
    return %c0_i32, %c0_i32_0 : i32, i32
  }
  func.func @transform_6(%arg0: i32) -> (i32, i32) {
    %c0_i32 = arith.constant 0 : i32
    %c0_i32_0 = arith.constant 0 : i32
    %c0_i32_1 = arith.constant 0 : i32
    return %c0_i32, %c0_i32_0 : i32, i32
  }
  func.func @transform_7(%arg0: i32) -> (i32, i32) {
    %c0_i32 = arith.constant 0 : i32
    %c0_i32_0 = arith.constant 0 : i32
    %c0_i32_1 = arith.constant 0 : i32
    return %c0_i32, %c0_i32_0 : i32, i32
  }
  func.func @transform_8(%arg0: i32) -> (i32, i32) {
    %c0_i32 = arith.constant 0 : i32
    %c0_i32_0 = arith.constant 0 : i32
    %c0_i32_1 = arith.constant 0 : i32
    return %c0_i32, %c0_i32_0 : i32, i32
  }
  func.func @transform_9(%arg0: i32) -> (i32, i32) {
    %c0_i32 = arith.constant 0 : i32
    %c0_i32_0 = arith.constant 0 : i32
    %c0_i32_1 = arith.constant 0 : i32
    return %c0_i32, %c0_i32_0 : i32, i32
  }
  func.func @transform_10(%arg0: i32) -> (i32, i32) {
    %c0_i32 = arith.constant 0 : i32
    %c0_i32_0 = arith.constant 0 : i32
    %c0_i32_1 = arith.constant 0 : i32
    return %c0_i32, %c0_i32_0 : i32, i32
  }
}

</mosaic_0001>

<bundles_post_ra>
// kernel: _forward_impl.1
= control target key start
LH: loop header
LB: loop body
LE: loop exit
PB: predicated region body
PF: predicated region fallthrough
CT: control target
= control target key end

     0   :  { %v3250_v54 = vmov 0.0   ;;  %vm3251_vm0 = vmmov 0   ;;  %vm605_vm1 = vcmask 130048   ;;  %vm1386_vm2 = vcmask 261120   ;;  %s3893_s1 = inlined_call_operand.vmem [shape: bf16[768,32], index: 1, kind: input, shape index: {}]   ;;  %s3894_s0 = inlined_call_operand.vmem [shape: bf16[16,768], index: 0, kind: input, shape index: {}]   ;;  %s3895_s4 = inlined_call_operand.vmem [shape: bf16[16,32,128], index: 4, kind: input, shape index: {}]   ;;  %s3896_s2 = inlined_call_operand.vmem [shape: f32[1,32], index: 2, kind: input, shape index: {}]   ;;  %s3897_s3 = inlined_call_operand.vmem [shape: bf16[16,8,16], index: 3, kind: input, shape index: {}]   ;;  %s3898_s6 = inlined_call_operand.vmem [shape: bf16[128,128], index: 6, kind: input, shape index: {}]   ;;  %s3899_s8 = inlined_call_operand.vmem [shape: bf16[128,256], index: 8, kind: input, shape index: {}]   ;;  %s3900_s5 = inlined_call_operand.vmem [shape: f32[1,128], index: 5, kind: input, shape index: {}]   ;;  %s3901_s7 = inlined_call_operand.vmem [shape: f32[1,128], index: 7, kind: input, shape index: {}]   ;;  %s3902_s9 = inlined_call_operand.vmem [shape: f32[1,256], index: 9, kind: input, shape index: {}]   ;;  %s3903_s10 = inlined_call_operand.vmem [shape: f32[8,128], index: 10, kind: output, shape index: {}]  }
   0x1   :  { %v3121_v0 = vld [vmem:[%s3893_s1 + $0x78] sm:$0xff]   ;;  %v3125_v4 = vld [vmem:[%s3893_s1 + $0x70] sm:$0xff]   ;;  %v3129_v8 = vld [vmem:[%s3893_s1 + $0x68] sm:$0xff]  }
   0x2   :  { %v3122_v1 = vld [vmem:[%s3893_s1 + $0x38] sm:$0xff]   ;;  %2719 = vmatprep.subr.bf16.mxu0 %v3121_v0  ;;  %v3126_v5 = vld [vmem:[%s3893_s1 + $0x30] sm:$0xff]   ;;  %v3130_v9 = vld [vmem:[%s3893_s1 + $0x28] sm:$0xff]  }
   0x3   :  { %v3123_v2 = vld [vmem:[%s3893_s1 + $0xf8] sm:$0xff]   ;;  %2720 = vmatpush3.bf16.msra.mxu0 %v3122_v1  ;;  %v3127_v6 = vld [vmem:[%s3893_s1 + $0xf0] sm:$0xff]   ;;  %v3131_v10 = vld [vmem:[%s3893_s1 + $0xe8] sm:$0xff]  }
   0x4   :  { %v3124_v3 = vld [vmem:[%s3893_s1 + $0xb8] sm:$0xff]   ;;  %2741 = vmatprep.subr.bf16.mxu1 %v3123_v2  ;;  %2721 = vmatprep.subr.bf16.mxu0 %v3125_v4  ;;  %v3128_v7 = vld [vmem:[%s3893_s1 + $0xb0] sm:$0xff]   ;;  %v3132_v11 = vld [vmem:[%s3893_s1 + $0xa8] sm:$0xff]  }
   0x5   :  { %2742 = vmatpush3.bf16.msra.mxu1 %v3124_v3  ;;  %v3133_v12 = vld [vmem:[%s3893_s1 + $0x60] sm:$0xff]   ;;  %v3137_v16 = vld [vmem:[%s3893_s1 + $0x58] sm:$0xff]   ;;  %v3141_v20 = vld [vmem:[%s3893_s1 + $0x50] sm:$0xff]  }
   0x6   :  { %2743 = vmatprep.subr.bf16.mxu1 %v3127_v6  ;;  %v3134_v13 = vld [vmem:[%s3893_s1 + $0x20] sm:$0xff]   ;;  %v3138_v17 = vld [vmem:[%s3893_s1 + $0x18] sm:$0xff]   ;;  %v3142_v21 = vld [vmem:[%s3893_s1 + $0x10] sm:$0xff]  }
   0x7   :  { %2722 = vmatpush3.bf16.msra.mxu0 %v3126_v5  ;;  %v3135_v14 = vld [vmem:[%s3893_s1 + $0xe0] sm:$0xff]   ;;  %v3139_v18 = vld [vmem:[%s3893_s1 + $0xd8] sm:$0xff]   ;;  %v3143_v22 = vld [vmem:[%s3893_s1 + $0xd0] sm:$0xff]  }
   0x8   :  { %2723 = vmatprep.subr.bf16.mxu0 %v3129_v8  ;;  %v3136_v15 = vld [vmem:[%s3893_s1 + $0xa0] sm:$0xff]   ;;  %v3140_v19 = vld [vmem:[%s3893_s1 + $0x98] sm:$0xff]   ;;  %v3144_v23 = vld [vmem:[%s3893_s1 + $0x90] sm:$0xff]  }
   0x9   :  { %2744 = vmatpush3.bf16.msra.mxu1 %v3128_v7  ;;  %v3145_v24 = vld [vmem:[%s3893_s1 + $0x48] sm:$0xff]   ;;  %v3149_v28 = vld [vmem:[%s3893_s1 + $0x40] sm:$0xff]   ;;  %v3156_v34 = vld [vmem:[%s3893_s1 + $0x178] sm:$0xff]  }
   0xa   :  { %2745 = vmatprep.subr.bf16.mxu1 %v3131_v10  ;;  %v3146_v25 = vld [vmem:[%s3893_s1 + $0x8] sm:$0xff]   ;;  %v3150_v29 = vld [vmem:[%s3893_s1] sm:$0xff]   ;;  %v3160_v37 = vld [vmem:[%s3893_s1 + $0x138] sm:$0xff]  }
   0xb   :  { %2724 = vmatpush3.bf16.msra.mxu0 %v3130_v9  ;;  %v3147_v26 = vld [vmem:[%s3893_s1 + $0xc8] sm:$0xff]   ;;  %v3151_v30 = vld [vmem:[%s3893_s1 + $0xc0] sm:$0xff]   ;;  %v3161_v38 = vld [vmem:[%s3893_s1 + $0x170] sm:$0xff]  }
   0xc   :  { %2725 = vmatprep.subr.bf16.mxu0 %v3133_v12  ;;  %v3148_v27 = vld [vmem:[%s3893_s1 + $0x88] sm:$0xff]   ;;  %v3152_v31 = vld [vmem:[%s3894_s0] ss:$24 sps:$4 sm:$0xff]   ;;  %v3154_v32 = vld [vmem:[%s3894_s0 + $0x4] ss:$24 sps:$4 sm:$0xff]  }
   0xd   :  { %2746 = vmatpush3.bf16.msra.mxu1 %v3132_v11  ;;  %v3155_v33 = vld [vmem:[%s3893_s1 + $0x80] sm:$0xff]   ;;  %495 = vmatprep.mubr.bf16.mxu0 %v3154_v32  ;;  %v3162_v39 = vld [vmem:[%s3893_s1 + $0x130] sm:$0xff]   ;;  %v3163_v40 = vld [vmem:[%s3893_s1 + $0x168] sm:$0xff]  }
   0xe   :  { %2747 = vmatprep.subr.bf16.mxu1 %v3135_v14  ;;  %v3157_v35 = vld [vmem:[%s3894_s0 + $0x8] ss:$24 sps:$4 sm:$0xff]   ;;  %v3159_v36 = vld [vmem:[%s3894_s0 + $0xc] ss:$24 sps:$4 sm:$0xff]   ;;  %v3167_v44 = vld [vmem:[%s3893_s1 + $0x158] sm:$0xff]  }
   0xf   :  { %2726 = vmatpush3.bf16.msra.mxu0 %v3134_v13  ;;  %536 = vmatprep.mubr.bf16.mxu1 %v3159_v36  ;;  %v3164_v41 = vld [vmem:[%s3893_s1 + $0x128] sm:$0xff]   ;;  %v3165_v42 = vld [vmem:[%s3893_s1 + $0x160] sm:$0xff]   ;;  %v3168_v45 = vld [vmem:[%s3893_s1 + $0x118] sm:$0xff]  }
  0x10   :  { %2727 = vmatprep.subr.bf16.mxu0 %v3137_v16  ;;  %v3166_v43 = vld [vmem:[%s3893_s1 + $0x120] sm:$0xff]   ;;  %v3169_v46 = vld [vmem:[%s3893_s1 + $0x150] sm:$0xff]   ;;  %v3171_v49 = vld [vmem:[%s3893_s1 + $0x148] sm:$0xff]  }
  0x11   :  { %2748 = vmatpush3.bf16.msra.mxu1 %v3136_v15  ;;  %v3177_v47 = vld [vmem:[%s3894_s0 + $0x14] ss:$24 sps:$4 sm:$0xff]   ;;  %v3173_v51 = vld [vmem:[%s3893_s1 + $0x140] sm:$0xff]   ;;  %v3175_v53 = vld [vmem:[%s3894_s0 + $0x10] ss:$24 sps:$4 sm:$0xff]  }
  0x12   :  { %2749 = vmatprep.subr.bf16.mxu1 %v3139_v18  ;;  %v3170_v48 = vld [vmem:[%s3893_s1 + $0x110] sm:$0xff]   ;;  %v3172_v50 = vld [vmem:[%s3893_s1 + $0x108] sm:$0xff]   ;;  %v3174_v52 = vld [vmem:[%s3893_s1 + $0x100] sm:$0xff]  }
  0x13   :  { %2728 = vmatpush3.bf16.msra.mxu0 %v3138_v17  ;;  %v2574_v63 = vld [vmem:[%s3896_s2] ss:$0 sm:$0xff]  ;;  %v598_v32 = vld [vmem:[%s3897_s3 + $0x24] sm:$0xf]  ;;  %v604_v36 = vld [vmem:[%s3897_s3 + $0x3c] sm:$0xf] }
  0x14   :  { %2729 = vmatprep.subr.bf16.mxu0 %v3141_v20  ;;  %v593_v20 = vld [vmem:[%s3897_s3 + $0x10] sm:$0xf] }
  0x15   :  { %2750 = vmatpush3.bf16.msra.mxu1 %v3140_v19  ;;  %v589_v19 = vld [vmem:[%s3897_s3] sm:$0xf] }
  0x16   :  { %2751 = vmatprep.subr.bf16.mxu1 %v3143_v22  ;;  %v595_v22 = vld [vmem:[%s3897_s3 + $0x18] sm:$0xf] }
  0x17   :  { %2730 = vmatpush3.bf16.msra.mxu0 %v3142_v21  ;;  %v590_v21 = vld [vmem:[%s3897_s3 + $0x4] sm:$0xf] }
  0x18   :  { %2731 = vmatprep.subr.bf16.mxu0 %v3145_v24  ;;  %v597_v24 = vld [vmem:[%s3897_s3 + $0x20] sm:$0xf] }
  0x19   :  { %2752 = vmatpush3.bf16.msra.mxu1 %v3144_v23  ;;  %v591_v23 = vld [vmem:[%s3897_s3 + $0x8] sm:$0xf] }
  0x1a   :  { %2753 = vmatprep.subr.bf16.mxu1 %v3147_v26  ;;  %v599_v26 = vld [vmem:[%s3897_s3 + $0x28] sm:$0xf] }
  0x1b   :  { %2732 = vmatpush3.bf16.msra.mxu0 %v3146_v25  ;;  %v592_v25 = vld [vmem:[%s3897_s3 + $0xc] sm:$0xf] }
  0x1c   :  { %2733 = vmatprep.subr.bf16.mxu0 %v3149_v28  ;;  %v601_v28 = vld [vmem:[%s3897_s3 + $0x30] sm:$0xf] }
  0x1d   :  { %2754 = vmatpush3.bf16.msra.mxu1 %v3148_v27  ;;  %v594_v27 = vld [vmem:[%s3897_s3 + $0x14] sm:$0xf] }
  0x1e   :  { %2755 = vmatprep.subr.bf16.mxu1 %v3151_v30  ;;  %v603_v30 = vld [vmem:[%s3897_s3 + $0x38] sm:$0xf] }
  0x1f   :  { %2734 = vmatpush3.bf16.msra.mxu0 %v3150_v29  ;;  %v596_v29 = vld [vmem:[%s3897_s3 + $0x1c] sm:$0xf] }
  0x20   :  { %2763 = vmatprep.subr.bf16.mxu0 %v3156_v34  ;;  %v602_v34 = vld [vmem:[%s3897_s3 + $0x34] sm:$0xf] }
  0x21   :  { %2756 = vmatpush3.bf16.msra.mxu1 %v3155_v33  ;;  %v600_v33 = vld [vmem:[%s3897_s3 + $0x2c] sm:$0xf] }
  0x22   :  { %496 = vmatmul.mubr.bf16.vlgmr.msra.gmra.mxu0 %v3152_v31  ;;  %2874 = vmatprep.subr.bf16.mxu1 %v3250_v54  ;;  %v3178_v31 = vld [vmem:[%s3895_s4 + $0x8] sm:$0xff]  }
  0x23   :  { %2764 = vmatpush3.bf16.msra.mxu0 %v3160_v37  ;;  %577 = vmatprep.mubr.bf16.mxu0 %v3177_v47  ;;  %v3180_v37 = vld [vmem:[%s3895_s4 + $0x18] sm:$0xff]  }
  0x24   :  { %537 = vmatmul.mubr.bf16.vlgmr.msra.gmra.mxu1 %v3157_v35  ;;  %2765 = vmatprep.subr.bf16.mxu0 %v3161_v38  ;;  %v3179_v35 = vld [vmem:[%s3895_s4] sm:$0xff]   ;;  %v3181_v38 = vld [vmem:[%s3895_s4 + $0x10] sm:$0xff]  }
  0x25   :  { %2876 = vmatprep.mubr.msk.bf16.mxu1 %vm3251_vm0, %v3250_v54 }
  0x27   :  { %2766 = vmatpush3.bf16.msra.mxu0 %v3162_v39 }
  0x28   :  { %2767 = vmatprep.subr.bf16.mxu0 %v3163_v40  ;;  %v3182_v40 = vld [vmem:[%s3895_s4 + $0x28] sm:$0xff]  }
  0x2b   :  { %2768 = vmatpush3.bf16.msra.mxu0 %v3164_v41 }
  0x2c   :  { %2769 = vmatprep.subr.bf16.mxu0 %v3165_v42 }
  0x2f   :  { %2770 = vmatpush3.bf16.msra.mxu0 %v3166_v43 }
  0x30   :  { %2771 = vmatprep.subr.bf16.mxu0 %v3167_v44 }
  0x33   :  { %2772 = vmatpush3.bf16.msra.mxu0 %v3168_v45 }
  0x34   :  { %2773 = vmatprep.subr.bf16.mxu0 %v3169_v46  ;;  %v3183_v46 = vld [vmem:[%s3895_s4 + $0x20] sm:$0xff]  }
  0x37   :  { %2774 = vmatpush3.bf16.msra.mxu0 %v3170_v48 }
  0x38   :  { %2775 = vmatprep.subr.bf16.mxu0 %v3171_v49 }
  0x3b   :  { %2776 = vmatpush3.bf16.msra.mxu0 %v3172_v50 }
  0x3c   :  { %2777 = vmatprep.subr.bf16.mxu0 %v3173_v51  ;;  %v3184_v51 = vld [vmem:[%s3895_s4 + $0x38] sm:$0xff]  }
  0x3f   :  { %2778 = vmatpush3.bf16.msra.mxu0 %v3174_v52 }
  0x40   :  { %2898 = vmatprep.subr.bf16.mxu0 %v3250_v54 }
  0x42   :  { %578 = vmatmul.mubr.bf16.vlgmr.msra.gmra.mxu0 %v3175_v53 }
  0x43   :  { %2900 = vmatprep.mubr.msk.bf16.mxu0 %vm3251_vm0, %v3250_v54 }
  0xe2   :  { %v2735_v55 = vpop.f32.mrf.mxu0 }
  0xe4   :  { %v2736_v56 = vpop.f32.mrf.mxu0  ;;  %v2757_v57 = vpop.f32.mrf.mxu1 }
  0xe5   :  { %v2737_v62 = vadd.f32 %v2736_v56, %v2735_v55 }
  0xe6   :  { %v2738_v58 = vpop.f32.mrf.mxu0  ;;  %v2758_v59 = vpop.f32.mrf.mxu1 }
  0xe7   :  { %v498_v3 = vadd.f32 %v2737_v62, %v2574_v63  ;;  %v2759_v4 = vadd.f32 %v2758_v59, %v2757_v57 }
  0xe8   :  { %v2739_v60 = vpop.f32.mrf.mxu0  ;;  %v2760_v61 = vpop.f32.mrf.mxu1 }
  0xe9   :  { %v2740_v0 = vadd.f32 %v2739_v60, %v2738_v58  ;;  %v539_v10 = vadd.f32 %v2759_v4, %v498_v3  ;;  %v3186_v58 = vld [vmem:[%s3895_s4 + $0x30] sm:$0xff]  }
  0xea   :  { %v2761_v1 = vpop.f32.mrf.mxu1 }
  0xeb   :  { %v501_v6 = vadd.f32 %v2740_v0, %v2574_v63  ;;  %v2762_v7 = vadd.f32 %v2761_v1, %v2760_v61  ;;  %v3185_v63 = vld [vmem:[%s3895_s4 + $0x48] sm:$0xff]  }
  0xed   :  { %v542_v12 = vadd.f32 %v2762_v7, %v501_v6 }
 0x102   :  { %v2779_v2 = vpop.f32.mrf.mxu0 }
 0x104   :  { %v2780_v5 = vpop.f32.mrf.mxu0 }
 0x105   :  { %v2781_v8 = vadd.f32 %v2780_v5, %v2779_v2  ;;  %v3187_v5 = vld [vmem:[%s3895_s4 + $0x40] sm:$0xff]  }
 0x106   :  { %v2782_v9 = vpop.f32.mrf.mxu0 }
 0x107   :  { %v580_v13 = vadd.f32 %v2781_v8, %v539_v10 }
 0x108   :  { %v2783_v11 = vpop.f32.mrf.mxu0 }
 0x109   :  { %v2784_v14 = vadd.f32 %v2783_v11, %v2782_v9  ;;  %v586_v16 = vmax.f32 %v580_v13, 0.0  ;;  %v3188_v11 = vld [vmem:[%s3895_s4 + $0x58] sm:$0xff]  }
 0x10b   :  { %v583_v15 = vadd.f32 %v2784_v14, %v542_v12  ;;  %v3189_v12 = vld [vmem:[%s3895_s4 + $0x68] sm:$0xff]  }
 0x10d   :  { %v587_v17 = vmax.f32 %v583_v15, 0.0 }
 0x10f   :  { %v3479_v18 = vpack.c.bf16 %v587_v17, %v586_v16 }
 0x111   :  { %2875 = vmatpush3.bf16.msra.mxu1 %v3479_v18  ;;  %2899 = vmatpush3.bf16.msra.mxu0 %v3479_v18 }
 0x112   :  { %2880 = vmatprep.subr.bf16.mxu1 %v3250_v54  ;;  %2910 = vmatprep.subr.bf16.mxu0 %v3250_v54 }
 0x114   :  { %2877 = vmatmul.mubr.msk.bf16.vlgmr.msra.gmra.mxu1 %vm605_vm1, %v589_v19  ;;  %2901 = vmatmul.mubr.msk.bf16.vlgmr.msra.gmra.mxu0 %vm605_vm1, %v593_v20  ;;  %v3191_v19 = vld [vmem:[%s3895_s4 + $0x60] sm:$0xff]  }
 0x115   :  { %2881 = vmatpush3.bf16.msra.mxu1 %v3479_v18  ;;  %2911 = vmatpush3.bf16.msra.mxu0 %v3479_v18 }
 0x116   :  { %2882 = vmatprep.mubr.msk.bf16.mxu1 %vm3251_vm0, %v3250_v54  ;;  %2886 = vmatprep.subr.bf16.mxu1 %v3250_v54 }
 0x117   :  { %2912 = vmatprep.mubr.msk.bf16.mxu0 %vm3251_vm0, %v3250_v54  ;;  %2922 = vmatprep.subr.bf16.mxu0 %v3250_v54 }
 0x11c   :  { %2883 = vmatmul.mubr.msk.bf16.vlgmr.msra.gmra.mxu1 %vm605_vm1, %v590_v21  ;;  %2913 = vmatmul.mubr.msk.bf16.vlgmr.msra.gmra.mxu0 %vm605_vm1, %v595_v22 }
 0x11d   :  { %2887 = vmatpush3.bf16.msra.mxu1 %v3479_v18  ;;  %2923 = vmatpush3.bf16.msra.mxu0 %v3479_v18 }
 0x11e   :  { %2888 = vmatprep.mubr.msk.bf16.mxu1 %vm3251_vm0, %v3250_v54  ;;  %2892 = vmatprep.subr.bf16.mxu1 %v3250_v54 }
 0x11f   :  { %2924 = vmatprep.mubr.msk.bf16.mxu0 %vm3251_vm0, %v3250_v54  ;;  %2934 = vmatprep.subr.bf16.mxu0 %v3250_v54 }
 0x124   :  { %2889 = vmatmul.mubr.msk.bf16.vlgmr.msra.gmra.mxu1 %vm605_vm1, %v591_v23  ;;  %2925 = vmatmul.mubr.msk.bf16.vlgmr.msra.gmra.mxu0 %vm605_vm1, %v597_v24 }
 0x125   :  { %2893 = vmatpush3.bf16.msra.mxu1 %v3479_v18  ;;  %2935 = vmatpush3.bf16.msra.mxu0 %v3479_v18 }
 0x126   :  { %2894 = vmatprep.mubr.msk.bf16.mxu1 %vm3251_vm0, %v3250_v54  ;;  %2904 = vmatprep.subr.bf16.mxu1 %v3250_v54 }
 0x127   :  { %2936 = vmatprep.mubr.msk.bf16.mxu0 %vm3251_vm0, %v3250_v54  ;;  %2946 = vmatprep.subr.bf16.mxu0 %v3250_v54 }
 0x12c   :  { %2895 = vmatmul.mubr.msk.bf16.vlgmr.msra.gmra.mxu1 %vm605_vm1, %v592_v25  ;;  %2937 = vmatmul.mubr.msk.bf16.vlgmr.msra.gmra.mxu0 %vm605_vm1, %v599_v26  ;;  %v3192_v25 = vld [vmem:[%s3895_s4 + $0x78] sm:$0xff]   ;;  %v3193_v26 = vld [vmem:[%s3895_s4 + $0x88] sm:$0xff]  }
 0x12d   :  { %2905 = vmatpush3.bf16.msra.mxu1 %v3479_v18  ;;  %2947 = vmatpush3.bf16.msra.mxu0 %v3479_v18 }
 0x12e   :  { %2906 = vmatprep.mubr.msk.bf16.mxu1 %vm3251_vm0, %v3250_v54  ;;  %2916 = vmatprep.subr.bf16.mxu1 %v3250_v54 }
 0x12f   :  { %2948 = vmatprep.mubr.msk.bf16.mxu0 %vm3251_vm0, %v3250_v54  ;;  %2958 = vmatprep.subr.bf16.mxu0 %v3250_v54 }
 0x134   :  { %2907 = vmatmul.mubr.msk.bf16.vlgmr.msra.gmra.mxu1 %vm605_vm1, %v594_v27  ;;  %2949 = vmatmul.mubr.msk.bf16.vlgmr.msra.gmra.mxu0 %vm605_vm1, %v601_v28 }
 0x135   :  { %2917 = vmatpush3.bf16.msra.mxu1 %v3479_v18  ;;  %2959 = vmatpush3.bf16.msra.mxu0 %v3479_v18 }
 0x136   :  { %2918 = vmatprep.mubr.msk.bf16.mxu1 %vm3251_vm0, %v3250_v54  ;;  %2928 = vmatprep.subr.bf16.mxu1 %v3250_v54 }
 0x137   :  { %2960 = vmatprep.mubr.msk.bf16.mxu0 %vm3251_vm0, %v3250_v54  ;;  %2970 = vmatprep.subr.bf16.mxu0 %v3250_v54 }
 0x13c   :  { %2919 = vmatmul.mubr.msk.bf16.vlgmr.msra.gmra.mxu1 %vm605_vm1, %v596_v29  ;;  %2961 = vmatmul.mubr.msk.bf16.vlgmr.msra.gmra.mxu0 %vm605_vm1, %v603_v30 }
 0x13d   :  { %2929 = vmatpush3.bf16.msra.mxu1 %v3479_v18  ;;  %2930 = vmatprep.mubr.msk.bf16.mxu1 %vm3251_vm0, %v3250_v54 }
 0x13e   :  { %2940 = vmatprep.subr.bf16.mxu1 %v3250_v54  ;;  %2971 = vmatpush3.bf16.msra.mxu0 %v3178_v31 }
 0x13f   :  { %2972 = vmatprep.subr.bf16.mxu0 %v3250_v54  ;;  %2974 = vmatprep.mubr.msk.bf16.mxu0 %vm3251_vm0, %v3250_v54 }
 0x142   :  { %2973 = vmatpush3.bf16.msra.mxu0 %v3179_v35 }
 0x143   :  { %2986 = vmatprep.subr.bf16.mxu0 %v3250_v54 }
 0x144   :  { %2931 = vmatmul.mubr.msk.bf16.vlgmr.msra.gmra.mxu1 %vm605_vm1, %v598_v32  ;;  %v3194_v32 = vld [vmem:[%s3895_s4 + $0x70] sm:$0xff]  }
 0x145   :  { %2941 = vmatpush3.bf16.msra.mxu1 %v3479_v18  ;;  %2942 = vmatprep.mubr.msk.bf16.mxu1 %vm3251_vm0, %v3250_v54 }
 0x146   :  { %2952 = vmatprep.subr.bf16.mxu1 %v3250_v54 }
 0x14c   :  { %2943 = vmatmul.mubr.msk.bf16.vlgmr.msra.gmra.mxu1 %vm605_vm1, %v600_v33  ;;  %v3195_v33 = vld [vmem:[%s3895_s4 + $0x80] sm:$0xff]  }
 0x14d   :  { %2953 = vmatpush3.bf16.msra.mxu1 %v3479_v18  ;;  %2954 = vmatprep.mubr.msk.bf16.mxu1 %vm3251_vm0, %v3250_v54 }
 0x14e   :  { %2964 = vmatprep.subr.bf16.mxu1 %v3250_v54 }
 0x154   :  { %2955 = vmatmul.mubr.msk.bf16.vlgmr.msra.gmra.mxu1 %vm605_vm1, %v602_v34 }
 0x155   :  { %2965 = vmatpush3.bf16.msra.mxu1 %v3479_v18  ;;  %2966 = vmatprep.mubr.msk.bf16.mxu1 %vm3251_vm0, %v3250_v54  ;;  %v3190_v18 = vld [vmem:[%s3895_s4 + $0x50] sm:$0xff]  }
 0x156   :  { %2978 = vmatprep.subr.bf16.mxu1 %v3250_v54 }
 0x15c   :  { %2967 = vmatmul.mubr.msk.bf16.vlgmr.msra.gmra.mxu1 %vm605_vm1, %v604_v36 }
 0x15d   :  { %2979 = vmatpush3.bf16.msra.mxu1 %v3180_v37  ;;  %2982 = vmatprep.mubr.msk.bf16.mxu1 %vm3251_vm0, %v3250_v54 }
 0x15e   :  { %2980 = vmatprep.subr.bf16.mxu1 %v3250_v54 }
 0x161   :  { %2981 = vmatpush3.bf16.msra.mxu1 %v3181_v38 }
 0x162   :  { %2994 = vmatprep.subr.bf16.mxu1 %v3250_v54 }
 0x1d4   :  { %v643_v39 = vpop.f32.mrf.mxu1  ;;  %v815_v41 = vpop.f32.mrf.mxu0 }
 0x1d5   :  { %v1294_v42 = vpack.c.bf16 %v643_v39, %v643_v39  ;;  %v1298_v9 = vpack.c.bf16 %v815_v41, %v815_v41  ;;  %v3196_v39 = vld [vmem:[%s3895_s4 + $0x98] sm:$0xff]  }
 0x1d6   :  { %v2878_v43 = vpop.f32.mrf.mxu1  ;;  %v2902_v44 = vpop.f32.mrf.mxu0 }
 0x1d7   :  { %2975 = vmatmul.mubr.msk.bf16.vlgmr.msra.gmra.mxu0 %vm1386_vm2, %v1294_v42 }
 0x1d8   :  { %v646_v45 = vpop.f32.mrf.mxu1  ;;  %2987 = vmatpush3.bf16.msra.mxu0 %v3182_v40  ;;  %2990 = vmatprep.mubr.msk.bf16.mxu0 %vm3251_vm0, %v3250_v54  ;;  %v818_v47 = vpop.f32.mrf.mxu0  ;;  %v3197_v40 = vld [vmem:[%s3895_s4 + $0xa8] sm:$0xff]  }
 0x1d9   :  { %2988 = vmatprep.subr.bf16.mxu0 %v3250_v54  ;;  %v3199_v47 = vld [vmem:[%s3895_s4 + $0xa0] sm:$0xff]  }
 0x1da   :  { %v2879_v48 = vpop.f32.mrf.mxu1  ;;  %v2903_v49 = vpop.f32.mrf.mxu0 }
 0x1dc   :  { %v686_v50 = vpop.f32.mrf.mxu1  ;;  %2989 = vmatpush3.bf16.msra.mxu0 %v3183_v46  ;;  %v3638_v52 = vpop.f32.mrf.mxu0  ;;  %v3198_v46 = vld [vmem:[%s3895_s4 + $0x90] sm:$0xff]  }
 0x1dd   :  { %v1295_v53 = vpack.c.bf16 %v686_v50, %v686_v50  ;;  %3002 = vmatprep.subr.bf16.mxu0 %v3250_v54  ;;  %v1300_v23 = vpack.c.bf16 %v3638_v52, %v3638_v52 }
 0x1de   :  { %v2884_v55 = vpop.f32.mrf.mxu1  ;;  %v2914_v56 = vpop.f32.mrf.mxu0 }
 0x1df   :  { %2983 = vmatmul.mubr.msk.bf16.vlgmr.msra.gmra.mxu1 %vm1386_vm2, %v1295_v53  ;;  %v3200_v53 = vld [vmem:[%s3895_s4 + $0xb8] sm:$0xff]   ;;  %v3201_v55 = vld [vmem:[%s3895_s4 + $0xc8] sm:$0xff]  }
 0x1e0   :  { %v689_v57 = vpop.f32.mrf.mxu1  ;;  %2995 = vmatpush3.bf16.msra.mxu1 %v3184_v51  ;;  %2998 = vmatprep.mubr.msk.bf16.mxu1 %vm3251_vm0, %v3250_v54  ;;  %v904_v59 = vpop.f32.mrf.mxu0 }
 0x1e1   :  { %2996 = vmatprep.subr.bf16.mxu1 %v3250_v54  ;;  %v3202_v59 = vld [vmem:[%s3895_s4 + $0xb0] sm:$0xff]  }
 0x1e2   :  { %v2885_v60 = vpop.f32.mrf.mxu1  ;;  %v2915_v61 = vpop.f32.mrf.mxu0 }
 0x1e3   :  { %v3203_v60 = vld [vmem:[%s3895_s4 + $0xc0] sm:$0xff]  }
 0x1e4   :  { %v729_v62 = vpop.f32.mrf.mxu1  ;;  %2997 = vmatpush3.bf16.msra.mxu1 %v3186_v58  ;;  %v3651_v0 = vpop.f32.mrf.mxu0 }
 0x1e5   :  { %v1296_v1 = vpack.c.bf16 %v729_v62, %v729_v62  ;;  %3010 = vmatprep.subr.bf16.mxu1 %v3250_v54  ;;  %v1302_v37 = vpack.c.bf16 %v3651_v0, %v3651_v0  ;;  %v3204_v0 = vld [vmem:[%s3895_s4 + $0xd8] sm:$0xff]  }
 0x1e6   :  { %v2890_v2 = vpop.f32.mrf.mxu1  ;;  %v2926_v3 = vpop.f32.mrf.mxu0 }
 0x1e7   :  { %2991 = vmatmul.mubr.msk.bf16.vlgmr.msra.gmra.mxu0 %vm1386_vm2, %v1296_v1  ;;  %v3205_v1 = vld [vmem:[%s3895_s4 + $0xe8] sm:$0xff]  }
 0x1e8   :  { %v732_v4 = vpop.f32.mrf.mxu1  ;;  %3003 = vmatpush3.bf16.msra.mxu0 %v3185_v63  ;;  %3006 = vmatprep.mubr.msk.bf16.mxu0 %vm3251_vm0, %v3250_v54  ;;  %v990_v6 = vpop.f32.mrf.mxu0 }
 0x1e9   :  { %3004 = vmatprep.subr.bf16.mxu0 %v3250_v54  ;;  %v3207_v6 = vld [vmem:[%s3895_s4 + $0xe0] sm:$0xff]  }
 0x1ea   :  { %v2891_v7 = vpop.f32.mrf.mxu1  ;;  %v2927_v8 = vpop.f32.mrf.mxu0 }
 0x1ec   :  { %v772_v10 = vpop.f32.mrf.mxu1  ;;  %3005 = vmatpush3.bf16.msra.mxu0 %v3187_v5  ;;  %v3667_v13 = vpop.f32.mrf.mxu0  ;;  %v3206_v5 = vld [vmem:[%s3895_s4 + $0xd0] sm:$0xff]  }
 0x1ed   :  { %v1297_v14 = vpack.c.bf16 %v772_v10, %v772_v10  ;;  %3018 = vmatprep.subr.bf16.mxu0 %v3250_v54  ;;  %v1304_v51 = vpack.c.bf16 %v3667_v13, %v3667_v13  ;;  %v3208_v10 = vld [vmem:[%s3895_s4 + $0xf8] sm:$0xff]  }
 0x1ee   :  { %v2896_v15 = vpop.f32.mrf.mxu1  ;;  %v2938_v16 = vpop.f32.mrf.mxu0 }
 0x1ef   :  { %2999 = vmatmul.mubr.msk.bf16.vlgmr.msra.gmra.mxu1 %vm1386_vm2, %v1297_v14  ;;  %3007 = vmatmul.mubr.msk.bf16.vlgmr.msra.gmra.mxu0 %vm1386_vm2, %v1298_v9  ;;  %v3209_v14 = vld [vmem:[%s3895_s4 + $0xf0] sm:$0xff]  }
 0x1f0   :  { %v775_v17 = vpop.f32.mrf.mxu1  ;;  %3011 = vmatpush3.bf16.msra.mxu1 %v3188_v11  ;;  %3019 = vmatpush3.bf16.msra.mxu0 %v3189_v12  ;;  %v1076_v20 = vpop.f32.mrf.mxu0 }
 0x1f1   :  { %3012 = vmatprep.subr.bf16.mxu1 %v3250_v54  ;;  %3020 = vmatprep.subr.bf16.mxu0 %v3250_v54 }
 0x1f2   :  { %v2897_v21 = vpop.f32.mrf.mxu1  ;;  %3014 = vmatprep.mubr.msk.bf16.mxu1 %vm3251_vm0, %v3250_v54  ;;  %3022 = vmatprep.mubr.msk.bf16.mxu0 %vm3251_vm0, %v3250_v54  ;;  %v2939_v22 = vpop.f32.mrf.mxu0 }
 0x1f3   :  { %v3210_v21 = vld [vmem:[%s3898_s6 + $0x38] sm:$0xff]   ;;  %v3211_v22 = vld [vmem:[%s3898_s6 + $0x30] sm:$0xff]  }
 0x1f4   :  { %v858_v24 = vpop.f32.mrf.mxu1  ;;  %3013 = vmatpush3.bf16.msra.mxu1 %v3190_v18  ;;  %3021 = vmatpush3.bf16.msra.mxu0 %v3191_v19  ;;  %v3692_v27 = vpop.f32.mrf.mxu0 }
 0x1f5   :  { %v1299_v28 = vpack.c.bf16 %v858_v24, %v858_v24  ;;  %3026 = vmatprep.subr.bf16.mxu1 %v3250_v54  ;;  %3034 = vmatprep.subr.bf16.mxu0 %v3250_v54  ;;  %v1306_v62 = vpack.c.bf16 %v3692_v27, %v3692_v27  ;;  %v3213_v24 = vld [vmem:[%s3898_s6 + $0x20] sm:$0xff]   ;;  %v3216_v27 = vld [vmem:[%s3898_s6 + $0x8] sm:$0xff]  }
 0x1f6   :  { %v2908_v29 = vpop.f32.mrf.mxu1  ;;  %v2950_v30 = vpop.f32.mrf.mxu0 }
 0x1f7   :  { %3015 = vmatmul.mubr.msk.bf16.vlgmr.msra.gmra.mxu1 %vm1386_vm2, %v1299_v28  ;;  %3023 = vmatmul.mubr.msk.bf16.vlgmr.msra.gmra.mxu0 %vm1386_vm2, %v1300_v23  ;;  %v3212_v23 = vld [vmem:[%s3898_s6 + $0x28] sm:$0xff]   ;;  %v3217_v28 = vld [vmem:[%s3898_s6] sm:$0xff]   ;;  %v3218_v29 = vld [vmem:[%s3899_s8 + $0x70] ss:$8 sps:$4 sm:$0xff]  }
 0x1f8   :  { %v861_v31 = vpop.f32.mrf.mxu1  ;;  %3027 = vmatpush3.bf16.msra.mxu1 %v3192_v25  ;;  %3035 = vmatpush3.bf16.msra.mxu0 %v3193_v26  ;;  %v1162_v34 = vpop.f32.mrf.mxu0  ;;  %v3214_v25 = vld [vmem:[%s3898_s6 + $0x18] sm:$0xff]   ;;  %v3215_v26 = vld [vmem:[%s3898_s6 + $0x10] sm:$0xff]  }
 0x1f9   :  { %3028 = vmatprep.subr.bf16.mxu1 %v3250_v54  ;;  %3036 = vmatprep.subr.bf16.mxu0 %v3250_v54  ;;  %v3220_v30 = vld [vmem:[%s3899_s8 + $0x74] ss:$8 sps:$4 sm:$0xff]   ;;  %v3223_v31 = vld [vmem:[%s3899_s8 + $0x64] ss:$8 sps:$4 sm:$0xff]  }
 0x1fa   :  { %v2909_v35 = vpop.f32.mrf.mxu1  ;;  %3030 = vmatprep.mubr.msk.bf16.mxu1 %vm3251_vm0, %v3250_v54  ;;  %3038 = vmatprep.mubr.msk.bf16.mxu0 %vm3251_vm0, %v3250_v54  ;;  %v2951_v36 = vpop.f32.mrf.mxu0  ;;  %v3229_v34 = vld [vmem:[%s3899_s8 + $0x44] ss:$8 sps:$4 sm:$0xff]  }
 0x1fb   :  { %v3227_v35 = vld [vmem:[%s3899_s8 + $0x40] ss:$8 sps:$4 sm:$0xff]   ;;  %v3232_v36 = vld [vmem:[%s3899_s8 + $0x34] ss:$8 sps:$4 sm:$0xff]  }
 0x1fc   :  { %v944_v38 = vpop.f32.mrf.mxu1  ;;  %3029 = vmatpush3.bf16.msra.mxu1 %v3194_v32  ;;  %3037 = vmatpush3.bf16.msra.mxu0 %v3195_v33  ;;  %v3718_v41 = vpop.f32.mrf.mxu0  ;;  %v3226_v32 = vld [vmem:[%s3899_s8 + $0x54] ss:$8 sps:$4 sm:$0xff]   ;;  %v3224_v33 = vld [vmem:[%s3899_s8 + $0x50] ss:$8 sps:$4 sm:$0xff]  }
 0x1fd   :  { %v1301_v42 = vpack.c.bf16 %v944_v38, %v944_v38  ;;  %3042 = vmatprep.subr.bf16.mxu1 %v3250_v54  ;;  %3050 = vmatprep.subr.bf16.mxu0 %v3250_v54  ;;  %v1308_v8 = vpack.c.bf16 %v3718_v41, %v3718_v41  ;;  %v3235_v38 = vld [vmem:[%s3899_s8 + $0x24] ss:$8 sps:$4 sm:$0xff]   ;;  %v3236_v41 = vld [vmem:[%s3899_s8 + $0x10] ss:$8 sps:$4 sm:$0xff]  }
 0x1fe   :  { %v2920_v43 = vpop.f32.mrf.mxu1  ;;  %v2962_v44 = vpop.f32.mrf.mxu0 }
 0x1ff   :  { %3031 = vmatmul.mubr.msk.bf16.vlgmr.msra.gmra.mxu1 %vm1386_vm2, %v1301_v42  ;;  %3039 = vmatmul.mubr.msk.bf16.vlgmr.msra.gmra.mxu0 %vm1386_vm2, %v1302_v37  ;;  %v3230_v37 = vld [vmem:[%s3899_s8 + $0x30] ss:$8 sps:$4 sm:$0xff]  }
 0x200   :  { %v947_v45 = vpop.f32.mrf.mxu1  ;;  %3043 = vmatpush3.bf16.msra.mxu1 %v3196_v39  ;;  %3051 = vmatpush3.bf16.msra.mxu0 %v3197_v40  ;;  %v1248_v48 = vpop.f32.mrf.mxu0  ;;  %v3233_v39 = vld [vmem:[%s3899_s8 + $0x20] ss:$8 sps:$4 sm:$0xff]   ;;  %v3238_v40 = vld [vmem:[%s3899_s8 + $0x14] ss:$8 sps:$4 sm:$0xff]  }
 0x201   :  { %3044 = vmatprep.subr.bf16.mxu1 %v3250_v54  ;;  %3052 = vmatprep.subr.bf16.mxu0 %v3250_v54 }
 0x202   :  { %v2921_v49 = vpop.f32.mrf.mxu1  ;;  %3046 = vmatprep.mubr.msk.bf16.mxu1 %vm3251_vm0, %v3250_v54  ;;  %3054 = vmatprep.mubr.msk.bf16.mxu0 %vm3251_vm0, %v3250_v54  ;;  %v2963_v50 = vpop.f32.mrf.mxu0 }
 0x204   :  { %v1030_v52 = vpop.f32.mrf.mxu1  ;;  %3045 = vmatpush3.bf16.msra.mxu1 %v3198_v46  ;;  %3053 = vmatpush3.bf16.msra.mxu0 %v3199_v47 }
 0x205   :  { %v1303_v56 = vpack.c.bf16 %v1030_v52, %v1030_v52  ;;  %3058 = vmatprep.subr.bf16.mxu1 %v3250_v54  ;;  %3066 = vmatprep.subr.bf16.mxu0 %v3250_v54 }
 0x206   :  { %v2932_v57 = vpop.f32.mrf.mxu1 }
 0x207   :  { %3047 = vmatmul.mubr.msk.bf16.vlgmr.msra.gmra.mxu1 %vm1386_vm2, %v1303_v56  ;;  %3055 = vmatmul.mubr.msk.bf16.vlgmr.msra.gmra.mxu0 %vm1386_vm2, %v1304_v51 }
 0x208   :  { %v1033_v58 = vpop.f32.mrf.mxu1  ;;  %3059 = vmatpush3.bf16.msra.mxu1 %v3200_v53  ;;  %3067 = vmatpush3.bf16.msra.mxu0 %v3201_v55 }
 0x209   :  { %3060 = vmatprep.subr.bf16.mxu1 %v3250_v54  ;;  %3068 = vmatprep.subr.bf16.mxu0 %v3250_v54 }
 0x20a   :  { %v2933_v61 = vpop.f32.mrf.mxu1  ;;  %3062 = vmatprep.mubr.msk.bf16.mxu1 %vm3251_vm0, %v3250_v54  ;;  %3070 = vmatprep.mubr.msk.bf16.mxu0 %vm3251_vm0, %v3250_v54 }
 0x20c   :  { %v1116_v63 = vpop.f32.mrf.mxu1  ;;  %3061 = vmatpush3.bf16.msra.mxu1 %v3202_v59  ;;  %3069 = vmatpush3.bf16.msra.mxu0 %v3203_v60 }
 0x20d   :  { %v1305_v2 = vpack.c.bf16 %v1116_v63, %v1116_v63  ;;  %3074 = vmatprep.subr.bf16.mxu1 %v3250_v54  ;;  %3082 = vmatprep.subr.bf16.mxu0 %v3250_v54 }
 0x20e   :  { %v2944_v3 = vpop.f32.mrf.mxu1 }
 0x20f   :  { %3063 = vmatmul.mubr.msk.bf16.vlgmr.msra.gmra.mxu1 %vm1386_vm2, %v1305_v2  ;;  %3071 = vmatmul.mubr.msk.bf16.vlgmr.msra.gmra.mxu0 %vm1386_vm2, %v1306_v62 }
 0x210   :  { %v1119_v4 = vpop.f32.mrf.mxu1  ;;  %3075 = vmatpush3.bf16.msra.mxu1 %v3204_v0  ;;  %3083 = vmatpush3.bf16.msra.mxu0 %v3205_v1 }
 0x211   :  { %3076 = vmatprep.subr.bf16.mxu1 %v3250_v54  ;;  %3084 = vmatprep.subr.bf16.mxu0 %v3250_v54 }
 0x212   :  { %v2945_v7 = vpop.f32.mrf.mxu1  ;;  %3078 = vmatprep.mubr.msk.bf16.mxu1 %vm3251_vm0, %v3250_v54  ;;  %3086 = vmatprep.mubr.msk.bf16.mxu0 %vm3251_vm0, %v3250_v54 }
 0x214   :  { %v1202_v9 = vpop.f32.mrf.mxu1  ;;  %3077 = vmatpush3.bf16.msra.mxu1 %v3206_v5  ;;  %3085 = vmatpush3.bf16.msra.mxu0 %v3207_v6 }
 0x215   :  { %v1307_v11 = vpack.c.bf16 %v1202_v9, %v1202_v9  ;;  %3090 = vmatprep.subr.bf16.mxu1 %v3250_v54  ;;  %3098 = vmatprep.subr.bf16.mxu0 %v3250_v54 }
 0x216   :  { %v2956_v12 = vpop.f32.mrf.mxu1 }
 0x217   :  { %3079 = vmatmul.mubr.msk.bf16.vlgmr.msra.gmra.mxu1 %vm1386_vm2, %v1307_v11  ;;  %3087 = vmatmul.mubr.msk.bf16.vlgmr.msra.gmra.mxu0 %vm1386_vm2, %v1308_v8 }
 0x218   :  { %v1205_v13 = vpop.f32.mrf.mxu1  ;;  %3091 = vmatpush3.bf16.msra.mxu1 %v3208_v10  ;;  %3094 = vmatprep.mubr.msk.bf16.mxu1 %vm3251_vm0, %v3250_v54 }
 0x219   :  { %3092 = vmatprep.subr.bf16.mxu1 %v3250_v54  ;;  %3114 = vmatprep.mubr.msk.bf16.mxu0 %vm3251_vm0, %v3250_v54 }
 0x21a   :  { %v2957_v15 = vpop.f32.mrf.mxu1  ;;  %3099 = vmatpush3.bf16.msra.mxu0 %v3210_v21 }
 0x21b   :  { %3100 = vmatprep.subr.bf16.mxu0 %v3250_v54 }
 0x21c   :  { %v1288_v16 = vpop.f32.mrf.mxu1  ;;  %3093 = vmatpush3.bf16.msra.mxu1 %v3209_v14 }
 0x21d   :  { %v1309_v17 = vpack.c.bf16 %v1288_v16, %v1288_v16  ;;  %2501 = vmatprep.subr.bf16.mxu1 %v3220_v30 }
 0x21e   :  { %v2968_v18 = vpop.f32.mrf.mxu1  ;;  %3101 = vmatpush3.bf16.msra.mxu0 %v3211_v22 }
 0x21f   :  { %3095 = vmatmul.mubr.msk.bf16.vlgmr.msra.gmra.mxu1 %vm1386_vm2, %v1309_v17  ;;  %3102 = vmatprep.subr.bf16.mxu0 %v3250_v54 }
 0x220   :  { %v1291_v19 = vpop.f32.mrf.mxu1  ;;  %2502 = vmatpush1.bf16.msra.mxu1 %v3218_v29 }
 0x221   :  { %2503 = vmatprep.subr.bf16.mxu1 %v3223_v31 }
 0x222   :  { %v2969_v20 = vpop.f32.mrf.mxu1  ;;  %3103 = vmatpush3.bf16.msra.mxu0 %v3212_v23 }
 0x223   :  { %3104 = vmatprep.subr.bf16.mxu0 %v3250_v54 }
 0x226   :  { %3105 = vmatpush3.bf16.msra.mxu0 %v3213_v24 }
 0x227   :  { %3106 = vmatprep.subr.bf16.mxu0 %v3250_v54 }
 0x22a   :  { %3107 = vmatpush3.bf16.msra.mxu0 %v3214_v25 }
 0x22b   :  { %3108 = vmatprep.subr.bf16.mxu0 %v3250_v54 }
 0x22e   :  { %3109 = vmatpush3.bf16.msra.mxu0 %v3215_v26 }
 0x22f   :  { %3110 = vmatprep.subr.bf16.mxu0 %v3250_v54 }
 0x232   :  { %3111 = vmatpush3.bf16.msra.mxu0 %v3216_v27 }
 0x233   :  { %3112 = vmatprep.subr.bf16.mxu0 %v3250_v54  ;;  %v3221_v54 = vld [vmem:[%s3899_s8 + $0x60] ss:$8 sps:$4 sm:$0xff]  }
 0x234   :  { %2504 = vmatpush1.bf16.msra.mxu1 %v3221_v54 }
 0x235   :  { %2505 = vmatprep.subr.bf16.mxu1 %v3226_v32 }
 0x236   :  { %3113 = vmatpush3.bf16.msra.mxu0 %v3217_v28 }
 0x238   :  { %2506 = vmatpush1.bf16.msra.mxu1 %v3224_v33 }
 0x239   :  { %2507 = vmatprep.subr.bf16.mxu1 %v3229_v34 }
 0x23c   :  { %2508 = vmatpush1.bf16.msra.mxu1 %v3227_v35 }
 0x23d   :  { %2509 = vmatprep.subr.bf16.mxu1 %v3232_v36 }
 0x240   :  { %2510 = vmatpush1.bf16.msra.mxu1 %v3230_v37 }
 0x241   :  { %2511 = vmatprep.subr.bf16.mxu1 %v3235_v38 }
 0x244   :  { %2512 = vmatpush1.bf16.msra.mxu1 %v3233_v39 }
 0x245   :  { %2513 = vmatprep.subr.bf16.mxu1 %v3238_v40 }
 0x248   :  { %2514 = vmatpush1.bf16.msra.mxu1 %v3236_v41 }
 0x297   :  { %v1424_v42 = vpop.f32.mrf.mxu0 }
 0x299   :  { %v2976_v43 = vpop.f32.mrf.mxu0 }
 0x29b   :  { %v1427_v44 = vpop.f32.mrf.mxu0 }
 0x29d   :  { %v2977_v45 = vpop.f32.mrf.mxu0 }
 0x29f   :  { %v1479_v46 = vpop.f32.mrf.mxu1 }
 0x2a0   :  { %v2255_v1 = vadd.f32 %v1479_v46, %v1424_v42 }
 0x2a1   :  { %v2984_v47 = vpop.f32.mrf.mxu1 }
 0x2a3   :  { %v1482_v48 = vpop.f32.mrf.mxu1 }
 0x2a5   :  { %v2985_v49 = vpop.f32.mrf.mxu1 }
 0x2a7   :  { %v1534_v50 = vpop.f32.mrf.mxu0 }
 0x2a8   :  { %v2256_v4 = vadd.f32 %v2255_v1, %v1534_v50  ;;  %v2694_v1 = vld [vmem:[%s3901_s7] ss:$0 sm:$0xff] }
 0x2a9   :  { %v2992_v51 = vpop.f32.mrf.mxu0 }
 0x2ab   :  { %v1537_v52 = vpop.f32.mrf.mxu0 }
 0x2ad   :  { %v2993_v53 = vpop.f32.mrf.mxu0 }
 0x2ae   :  { %v2693_v53 = vld [vmem:[%s3900_s5] ss:$0 sm:$0xff] }
 0x2af   :  { %v1589_v55 = vpop.f32.mrf.mxu1  ;;  %v1644_v56 = vpop.f32.mrf.mxu0 }
 0x2b0   :  { %v2257_v7 = vadd.f32 %v2256_v4, %v1589_v55 }
 0x2b1   :  { %v3000_v57 = vpop.f32.mrf.mxu1  ;;  %v3008_v58 = vpop.f32.mrf.mxu0 }
 0x2b2   :  { %v2258_v12 = vadd.f32 %v2257_v7, %v1644_v56 }
 0x2b3   :  { %v1592_v59 = vpop.f32.mrf.mxu1  ;;  %v1647_v60 = vpop.f32.mrf.mxu0 }
 0x2b5   :  { %v3001_v61 = vpop.f32.mrf.mxu1  ;;  %v3009_v62 = vpop.f32.mrf.mxu0 }
 0x2b6   :  { %v3241_v62 = vld [vmem:[%s3899_s8 + $0x4] ss:$8 sps:$4 sm:$0xff]  }
 0x2b7   :  { %v1699_v63 = vpop.f32.mrf.mxu1  ;;  %v1754_v0 = vpop.f32.mrf.mxu0  ;;  %2515 = vmatprep.subr.bf16.mxu1 %v3241_v62 }
 0x2b8   :  { %v2259_v15 = vadd.f32 %v2258_v12, %v1699_v63  ;;  %v3239_v63 = vld [vmem:[%s3899_s8] ss:$8 sps:$4 sm:$0xff]  }
 0x2b9   :  { %v3016_v2 = vpop.f32.mrf.mxu1  ;;  %v3024_v3 = vpop.f32.mrf.mxu0  ;;  %2516 = vmatpush1.bf16.msra.mxu1 %v3239_v63  ;;  %v2409_v12 = vld [vmem:[%s3902_s9] sm:$0x3] }
 0x2ba   :  { %v2260_v20 = vadd.f32 %v2259_v15, %v1754_v0  ;;  %v3252_v0 = vmov 0  }
 0x2bb   :  { %v1702_v5 = vpop.f32.mrf.mxu1  ;;  %v1757_v6 = vpop.f32.mrf.mxu0  ;;  %2533 = vmatprep.mubr.bf16.mxu1 %v3252_v0 }
 0x2bd   :  { %v3017_v8 = vpop.f32.mrf.mxu1  ;;  %v3025_v9 = vpop.f32.mrf.mxu0 }
 0x2be   :  { %v2411_v9 = vlaneseq }
 0x2bf   :  { %v1809_v10 = vpop.f32.mrf.mxu1  ;;  %v1864_v11 = vpop.f32.mrf.mxu0 }
 0x2c0   :  { %v2261_v23 = vadd.f32 %v2260_v20, %v1809_v10  ;;  %v2412_v10 = vshrl.u32 %v2411_v9, 7 }
 0x2c1   :  { %v3032_v13 = vpop.f32.mrf.mxu1  ;;  %v3040_v14 = vpop.f32.mrf.mxu0 }
 0x2c2   :  { %v2262_v28 = vadd.f32 %v2261_v23, %v1864_v11  ;;  %v2413_v11 = vsub.s32 0, %v2412_v10 }
 0x2c3   :  { %v1812_v16 = vpop.f32.mrf.mxu1  ;;  %v1867_v17 = vpop.f32.mrf.mxu0 }
 0x2c4   :  { %v2414_v13 = vrot.slane %v2409_v12, %v2413_v11 }
 0x2c5   :  { %v3033_v18 = vpop.f32.mrf.mxu1  ;;  %v3041_v19 = vpop.f32.mrf.mxu0 }
 0x2c7   :  { %v1919_v21 = vpop.f32.mrf.mxu1  ;;  %v1974_v22 = vpop.f32.mrf.mxu0 }
 0x2c8   :  { %v2263_v31 = vadd.f32 %v2262_v28, %v1919_v21 }
 0x2c9   :  { %v3048_v24 = vpop.f32.mrf.mxu1  ;;  %v3056_v25 = vpop.f32.mrf.mxu0 }
 0x2ca   :  { %v2264_v35 = vadd.f32 %v2263_v31, %v1974_v22  ;;  %v2417_v22 = vsub.s32 1, %v2412_v10 }
 0x2cb   :  { %v1922_v26 = vpop.f32.mrf.mxu1  ;;  %v1977_v27 = vpop.f32.mrf.mxu0 }
 0x2cc   :  { %v2418_v25 = vrot.slane %v2409_v12, %v2417_v22 }
 0x2cd   :  { %v3049_v29 = vpop.f32.mrf.mxu1  ;;  %v3057_v30 = vpop.f32.mrf.mxu0 }
 0x2cf   :  { %v2029_v54 = vpop.f32.mrf.mxu1  ;;  %v2084_v32 = vpop.f32.mrf.mxu0 }
 0x2d0   :  { %v2265_v38 = vadd.f32 %v2264_v35, %v2029_v54 }
 0x2d1   :  { %v3064_v33 = vpop.f32.mrf.mxu1  ;;  %v3072_v34 = vpop.f32.mrf.mxu0 }
 0x2d2   :  { %v2266_v43 = vadd.f32 %v2265_v38, %v2084_v32 }
 0x2d3   :  { %v2032_v36 = vpop.f32.mrf.mxu1  ;;  %v2087_v37 = vpop.f32.mrf.mxu0 }
 0x2d5   :  { %v3065_v39 = vpop.f32.mrf.mxu1  ;;  %v3073_v40 = vpop.f32.mrf.mxu0 }
 0x2d7   :  { %v2139_v41 = vpop.f32.mrf.mxu1  ;;  %v2194_v42 = vpop.f32.mrf.mxu0 }
 0x2d8   :  { %v2267_v46 = vadd.f32 %v2266_v43, %v2139_v41 }
 0x2d9   :  { %v3080_v44 = vpop.f32.mrf.mxu1  ;;  %v3088_v45 = vpop.f32.mrf.mxu0 }
 0x2da   :  { %v2268_v51 = vadd.f32 %v2267_v46, %v2194_v42 }
 0x2db   :  { %v2142_v47 = vpop.f32.mrf.mxu1  ;;  %v2197_v48 = vpop.f32.mrf.mxu0 }
 0x2dd   :  { %v3081_v49 = vpop.f32.mrf.mxu1  ;;  %v3089_v50 = vpop.f32.mrf.mxu0 }
 0x2df   :  { %v2249_v52 = vpop.f32.mrf.mxu1 }
 0x2e0   :  { %v2269_v55 = vadd.f32 %v2268_v51, %v2249_v52 }
 0x2e1   :  { %v3096_v56 = vpop.f32.mrf.mxu1 }
 0x2e2   :  { %v2277_v57 = vadd.f32 %v2693_v53, %v2269_v55 }
 0x2e3   :  { %v2252_v58 = vpop.f32.mrf.mxu1 }
 0x2e4   :  { %v2278_v59 = vmax.f32 %v2277_v57, 0.0 }
 0x2e5   :  { %v3097_v60 = vpop.f32.mrf.mxu1 }
 0x2e6   :  { %v2279_v61 = vpack.c.bf16 %v2278_v59, %v2278_v59 }
 0x2e8   :  { %3115 = vmatmul.mubr.bf16.vlgmr.msra.gmra.mxu0 %v2279_v61 }
 0x3a8   :  { %v2385_v2 = vpop.f32.mrf.mxu0 }
 0x3a9   :  { %v2386_v3 = vadd.f32 %v2694_v1, %v2385_v2 }
 0x3aa   :  { %v3116_v4 = vpop.f32.mrf.mxu0 }
 0x3ab   :  { %v2391_v5 = vmax.f32 %v2386_v3, 0.0 }
 0x3ac   :  { %v2388_v6 = vpop.f32.mrf.mxu0 }
 0x3ad   :  { %v2392_v7 = vpack.c.bf16 %v2391_v5, %v2391_v5 }
 0x3ae   :  { %v3117_v8 = vpop.f32.mrf.mxu0 }
 0x3af   :  { %2534 = vmatmul.mubr.bf16.vlgmr.msra.gmra.mxu1 %v2392_v7 }
 0x46f   :  { %v2535_v14 = vpop.f32.mrf.mxu1 }
 0x470   :  { %v2536_v15 = vadd.f32 %v2535_v14, %v2414_v13 }
 0x471   :  { %v2537_v16 = vpop.f32.mrf.mxu1 }
 0x472   :  { %v2546_v17 = vrot.slane %v2536_v15, 4  ;;  %v2538_v28 = vadd.f32 %v2537_v16, %v2418_v25 }
 0x473   :  { %v2539_v18 = vpop.f32.mrf.mxu1 }
 0x474   :  { %v2547_v19 = vmax.f32 %v2536_v15, %v2546_v17  ;;  %v2563_v30 = vsub.f32 0.0, %v2538_v28 }
 0x475   :  { %v2540_v20 = vpop.f32.mrf.mxu1 }
 0x476   :  { %v2548_v21 = vrot.slane %v2547_v19, 2  ;;  %v2564_v31 = vmul.f32 1.442695, %v2563_v30 }
 0x478   :  { %v2549_v23 = vmax.f32 %v2547_v19, %v2548_v21 }
 0x47a   :  { %v2550_v24 = vrot.slane %v2549_v23, 1 }
 0x47c   :  { %v2551_v26 = vmax.f32 %v2549_v23, %v2550_v24 }
 0x47e   :  { %v2552_v27 = vsub.f32 %v2536_v15, %v2551_v26 }
 0x480   :  { %v2553_v29 = vmul.f32 1.442695, %v2552_v27 }
 0x482   :  { %3242 = vpow2.f32 %v2553_v29 }
 0x483   :  { %3244 = vpow2.f32 %v2564_v31 }
 0x48f   :  { %v3243_v54 = vpop.eup %3242 }
 0x490   :  { %v2555_v32 = vrot.slane %v3243_v54, 4  ;;  %v3245_v36 = vpop.eup %3244 }
 0x491   :  { %v2566_v39 = vadd.f32 1.0, %v3245_v36 }
 0x492   :  { %v2556_v33 = vadd.f32 %v3243_v54, %v2555_v32 }
 0x494   :  { %v2557_v34 = vrot.slane %v2556_v33, 2 }
 0x496   :  { %v2558_v35 = vadd.f32 %v2557_v34, %v2556_v33 }
 0x498   :  { %v2559_v37 = vrot.slane %v2558_v35, 1 }
 0x49a   :  { %v2560_v38 = vadd.f32 %v2559_v37, %v2558_v35 }
 0x49c   :  { %3246 = vrcp.f32 %v2560_v38 }
 0x49d   :  { %3248 = vrcp.f32 %v2566_v39 }
 0x4a9   :  { %v3247_v40 = vpop.eup %3246 }
 0x4aa   :  { %v2562_v41 = vmul.f32 %v3247_v40, %v3243_v54  ;;  %v3249_v42 = vpop.eup %3248 }
 0x4ac   :  { %v2568_v43 = vmul.f32 %v3249_v42, %v2562_v41 }
 0x4ae   :  { %2569 = vst [vmem:[%s3903_s10] sm:$0xff] %v2568_v43 }

</bundles_post_ra>
